<compile_context>
chip_gen: v5e
topology: v5e:2x2
jax: 0.10.0
libtpu: 0.0.40
codegen_flags: <defaults>
</compile_context>

<pallas_src>
import functools

import numpy as np
import jax
import jax.numpy as jnp
from jax.experimental import pallas as pl
from jax.experimental.pallas import tpu as pltpu


# ----------------------------------------------------------------------------
# Host-side hierarchy construction (replaces pd.read_csv of Hierarchical_label.csv)
# TODO(synk): CSV loading + Python set path-walking has no Pallas equivalent;
#             it is reproduced deterministically on the host as dense matrices.
# ----------------------------------------------------------------------------
def build_synthetic_hierarchy():
    hierarchy = {}

    def add_node(section, class_, subclass):
        if section not in hierarchy:
            hierarchy[section] = {"parent": None, "depth": 1}
        if class_ not in hierarchy:
            hierarchy[class_] = {"parent": section, "depth": 2}
        if subclass not in hierarchy:
            hierarchy[subclass] = {"parent": class_, "depth": 3}

    # 2 sections x 2 classes each x 2 subclasses each = 14 hierarchy nodes
    for i in range(1, 9):
        section = f"S{(i - 1) // 4 + 1}"
        class_ = f"C{(i - 1) // 2 + 1}"
        subclass = f"SC{i}"
        add_node(section, class_, subclass)
    return hierarchy


def hierarchy_matrices(hierarchy):
    all_labels = list(hierarchy.keys())
    label_to_index = {l: i for i, l in enumerate(all_labels)}
    L = len(all_labels)

    # ancestor[l, k] = 1 iff node k on path(l -> root), including l itself
    ancestor = np.zeros((L, L), dtype=np.float32)
    for label in all_labels:
        node = label
        while node is not None:
            ancestor[label_to_index[label], label_to_index[node]] = 1.0
            node = hierarchy[node]["parent"]
    return all_labels, label_to_index, ancestor


def labels_to_one_hot(labels_batch, label_to_index):
    B = len(labels_batch)
    L = len(label_to_index)
    one_hot = np.zeros((B, L), dtype=np.float32)
    for i, label_set in enumerate(labels_batch):
        for label in label_set:
            if label in label_to_index:
                one_hot[i, label_to_index[label]] = 1.0
    return one_hot


# ----------------------------------------------------------------------------
# Pallas kernel: hierarchical-jaccard mask + SupConLoss (single VMEM-resident block)
# ----------------------------------------------------------------------------
def hmlc_kernel(feat_ref, onehot_ref, anc_ref, loss_ref, *, inv_temp, b_real):
    feats = feat_ref[...]                 # f32 [Bp, Dp]   (zero-padded rows/cols)
    oh = onehot_ref[...]                  # f32 [Bp, Lp]   (binary)
    anc = anc_ref[...]                    # f32 [Lp, Lp]   (binary)
    Bp = feats.shape[0]
    Lp = oh.shape[1]

    # -- hierarchical jaccard mask -------------------------------------------
    # P[i, k] = 1 iff node k lies on the union of root-paths of sample i's labels.
    P = jnp.minimum(
        jnp.dot(oh, anc, preferred_element_type=jnp.float32), 1.0)      # [Bp, Lp]

    # intersection[i, j] = |path_i ∩ path_j|  (A·Aᵀ form: contract the lane dim
    # of both operands; no materialized transpose of P)
    inter = jax.lax.dot_general(
        P, P, (((1,), (1,)), ((), ())),
        preferred_element_type=jnp.float32)                             # [Bp, Bp]

    # |path_i| as a column vector (one lane-reduce of P); |path_j| as a row
    # vector via a tiny [1,Lp]·Pᵀ dot (M=1) — replaces the old [Bp,Lp] ones
    # matmul and broadcasts across rows for free.
    sizes_i = jnp.sum(P, axis=1, keepdims=True)                         # [Bp, 1]
    ones_row = jnp.ones((1, Lp), dtype=P.dtype)
    sizes_j = jax.lax.dot_general(
        ones_row, P, (((1,), (1,)), ((), ())),
        preferred_element_type=jnp.float32)                             # [1, Bp]

    union = sizes_i + sizes_j - inter
    mask = jnp.where(union > 0.0,
                     inter / jnp.where(union > 0.0, union, 1.0),
                     0.0)                                               # jaccard sim

    # -- SupConLoss (mask mode) ----------------------------------------------
    # one lane iota + one sublane iota instead of two full [Bp,Bp] int32 iotas
    col_ids = jax.lax.broadcasted_iota(jnp.int32, (1, Bp), 1)           # [1, Bp]
    row_ids = jax.lax.broadcasted_iota(jnp.int32, (Bp, 1), 0)           # [Bp, 1]
    valid_col = col_ids < b_real                   # exclude padded columns
    logits_mask = jnp.where(valid_col & (row_ids != col_ids), 1.0, 0.0)  # [Bp, Bp]

    # fold 1/temperature into the [Bp, Dp] operand instead of dividing [Bp, Bp]
    feats_sc = feats * jnp.float32(inv_temp)
    logits = jax.lax.dot_general(
        feats_sc, feats, (((1,), (1,)), ((), ())),
        preferred_element_type=jnp.float32)                             # [Bp, Bp]
    # row max over *real* columns only (matches the unpadded reference exactly)
    row_max = jnp.max(jnp.where(valid_col, logits, -1e30), axis=1, keepdims=True)
    logits = logits - row_max

    mask = mask * logits_mask
    exp_logits = jnp.exp(logits) * logits_mask
    log_prob = logits - jnp.log(
        jnp.sum(exp_logits, axis=1, keepdims=True) + 1e-12)

    mask_labels = jnp.where(mask > 0.0, 1.0, mask)
    mean_log_prob_pos = (
        jnp.sum(mask * log_prob, axis=1, keepdims=True)
        / (jnp.sum(mask_labels, axis=1, keepdims=True) + 1e-12))        # [Bp, 1]

    # padded rows contribute exactly 0; normalize by the real batch size
    loss_ref[...] = (-jnp.sum(mean_log_prob_pos, axis=0, keepdims=True)
                     * jnp.float32(1.0 / b_real))                       # [1, 1]


def _round_up(x, m):
    return ((x + m - 1) // m) * m


@functools.partial(jax.jit, static_argnames=("temperature",))
def hmlc_loss(features, one_hot, ancestor, temperature=0.07):
    """HMLC forward: features [B, D], one_hot [B, L], ancestor [L, L] -> scalar."""
    B, D = features.shape
    L = one_hot.shape[1]

    # Batch axis: pad only to the f32 sublane granule (8); padded rows are inert
    # (empty paths -> mask row 0 -> zero contribution) and we divide by B.
    # D / L (lane / contraction dims): pad to 128 so the MXU sees full tiles.
    Bp = _round_up(max(B, 1), 8)
    Dp = _round_up(max(D, 1), 128)
    Lp = _round_up(max(L, 1), 128)

    feats_p = jnp.pad(features.astype(jnp.float32), ((0, Bp - B), (0, Dp - D)))
    oh_p = jnp.pad(one_hot.astype(jnp.float32), ((0, Bp - B), (0, Lp - L)))
    anc_p = jnp.pad(ancestor.astype(jnp.float32), ((0, Lp - L), (0, Lp - L)))

    kernel = functools.partial(
        hmlc_kernel, inv_temp=1.0 / temperature, b_real=B)

    # Single invocation (no grid): the whole problem is VMEM-resident, so no
    # pipeline prologue/epilogue; all operands get whole-array VMEM blocks.
    # allow_input_fusion lets XLA fuse the pads/casts above into the input DMA
    # instead of materializing padded arrays in HBM.
    out = pl.pallas_call(
        kernel,
        out_shape=jax.ShapeDtypeStruct((1, 1), jnp.float32),
        compiler_params=pltpu.CompilerParams(
            allow_input_fusion=[True, True, True]),
    )(feats_p, oh_p, anc_p)
    return out[0, 0]


# pure-JAX reference (mirrors the PyTorch semantics) for a correctness check
def hmlc_loss_ref(features, one_hot, ancestor, temperature=0.07):
    f = features.astype(jnp.float32)
    oh = one_hot.astype(jnp.float32)
    anc = ancestor.astype(jnp.float32)

    P = jnp.minimum(oh @ anc, 1.0)
    inter = P @ P.T
    sizes = jnp.sum(P, axis=1)
    union = sizes[:, None] + sizes[None, :] - inter
    mask = jnp.where(union > 0, inter / jnp.where(union > 0, union, 1.0), 0.0)

    B = f.shape[0]
    logits = (f @ f.T) / temperature
    logits = logits - jnp.max(logits, axis=1, keepdims=True)
    logits_mask = 1.0 - jnp.eye(B, dtype=jnp.float32)
    mask = mask * logits_mask
    exp_logits = jnp.exp(logits) * logits_mask
    log_prob = logits - jnp.log(jnp.sum(exp_logits, axis=1, keepdims=True) + 1e-12)
    mask_labels = jnp.where(mask > 0, 1.0, mask)
    mlpp = jnp.sum(mask * log_prob, axis=1) / (jnp.sum(mask_labels, axis=1) + 1e-12)
    return -jnp.mean(mlpp)


if __name__ == "__main__":
    B, D = 8, 32

    hierarchy = build_synthetic_hierarchy()
    all_labels, label_to_index, ancestor_np = hierarchy_matrices(hierarchy)

    # one leaf label per sample, deterministic
    labels_batch = [[f"SC{i + 1}"] for i in range(B)]
    one_hot_np = labels_to_one_hot(labels_batch, label_to_index)

    key = jax.random.PRNGKey(0)
    features = jax.random.normal(key, (B, D), dtype=jnp.float32)
    one_hot = jnp.asarray(one_hot_np)
    ancestor = jnp.asarray(ancestor_np)

    loss = jax.block_until_ready(
        hmlc_loss(features, one_hot, ancestor, temperature=0.07))
    ref = jax.block_until_ready(
        hmlc_loss_ref(features, one_hot, ancestor, temperature=0.07))
    np.testing.assert_allclose(np.asarray(loss), np.asarray(ref),
                               rtol=1e-4, atol=1e-4)

    print("KERNEL_OK")
</pallas_src>

<mosaic_0001>
module attributes {stable_mosaic.version = 11 : i64} {
  func.func @hmlc_kernel(%arg0: memref<8x128xf32, #tpu.memory_space<vmem>>, %arg1: memref<8x128xf32, #tpu.memory_space<vmem>>, %arg2: memref<128x128xf32, #tpu.memory_space<vmem>>, %arg3: memref<1x1xf32, #tpu.memory_space<vmem>>) attributes {dimension_semantics = [], scalar_prefetch = 0 : i64, scratch_operands = 0 : i64, tpu.core_type = #tpu.core_type<tc>} {
    %c0 = arith.constant 0 : index
    %c0_0 = arith.constant 0 : index
    %0 = vector.load %arg0[%c0, %c0_0] : memref<8x128xf32, #tpu.memory_space<vmem>>, vector<8x128xf32>
    %c0_1 = arith.constant 0 : index
    %c0_2 = arith.constant 0 : index
    %1 = vector.load %arg1[%c0_1, %c0_2] : memref<8x128xf32, #tpu.memory_space<vmem>>, vector<8x128xf32>
    %c0_3 = arith.constant 0 : index
    %c0_4 = arith.constant 0 : index
    %2 = vector.load %arg2[%c0_3, %c0_4] : memref<128x128xf32, #tpu.memory_space<vmem>>, vector<128x128xf32>
    %cst = arith.constant dense<0.000000e+00> : vector<8x128xf32>
    %3 = tpu.matmul %1, %2, %cst {dimension_numbers = #tpu.dot_dimension_numbers<[1], [0], [0], [1], [0, 0, 1, 1], [], []>} : vector<8x128xf32>, vector<128x128xf32>, vector<8x128xf32> -> vector<8x128xf32>
    %cst_5 = arith.constant 1.000000e+00 : f32
    %4 = vector.broadcast %cst_5 : f32 to vector<8x128xf32>
    %5 = arith.minimumf %3, %4 : vector<8x128xf32>
    %cst_6 = arith.constant dense<0.000000e+00> : vector<8x8xf32>
    %6 = tpu.matmul %5, %5, %cst_6 {dimension_numbers = #tpu.dot_dimension_numbers<[1], [1], [0], [0], [0, 0, 1, 0], [], []>} : vector<8x128xf32>, vector<8x128xf32>, vector<8x8xf32> -> vector<8x8xf32>
    %cst_7 = arith.constant dense<0.000000e+00> : vector<8xf32>
    %7 = vector.multi_reduction <add>, %5, %cst_7 [1] : vector<8x128xf32> to vector<8xf32>
    %8 = vector.shape_cast %7 : vector<8xf32> to vector<8x1xf32>
    %cst_8 = arith.constant 1.000000e+00 : f32
    %9 = vector.broadcast %cst_8 : f32 to vector<1x128xf32>
    %cst_9 = arith.constant dense<0.000000e+00> : vector<1x8xf32>
    %10 = tpu.matmul %9, %5, %cst_9 {dimension_numbers = #tpu.dot_dimension_numbers<[1], [1], [0], [0], [0, 0, 1, 0], [], []>} : vector<1x128xf32>, vector<8x128xf32>, vector<1x8xf32> -> vector<1x8xf32>
    %11 = vector.broadcast %8 : vector<8x1xf32> to vector<8x8xf32>
    %12 = vector.broadcast %10 : vector<1x8xf32> to vector<8x8xf32>
    %13 = arith.addf %11, %12 : vector<8x8xf32>
    %14 = arith.subf %13, %6 : vector<8x8xf32>
    %cst_10 = arith.constant 0.000000e+00 : f32
    %15 = vector.broadcast %cst_10 : f32 to vector<8x8xf32>
    %16 = arith.cmpf ogt, %14, %15 : vector<8x8xf32>
    %cst_11 = arith.constant 0.000000e+00 : f32
    %17 = vector.broadcast %cst_11 : f32 to vector<8x8xf32>
    %18 = arith.cmpf ogt, %14, %17 : vector<8x8xf32>
    %cst_12 = arith.constant 1.000000e+00 : f32
    %19 = vector.broadcast %cst_12 : f32 to vector<8x8xf32>
    %20 = arith.select %18, %14, %19 : vector<8x8xi1>, vector<8x8xf32>
    %21 = arith.divf %6, %20 : vector<8x8xf32>
    %cst_13 = arith.constant 0.000000e+00 : f32
    %22 = vector.broadcast %cst_13 : f32 to vector<8x8xf32>
    %23 = arith.select %16, %21, %22 : vector<8x8xi1>, vector<8x8xf32>
    %24 = tpu.iota {dimensions = array<i32: 1>} : vector<1x8xi32>
    %25 = tpu.iota {dimensions = array<i32: 0>} : vector<8x1xi32>
    %c8_i32 = arith.constant 8 : i32
    %26 = vector.broadcast %c8_i32 : i32 to vector<1x8xi32>
    %27 = arith.cmpi slt, %24, %26 : vector<1x8xi32>
    %28 = vector.broadcast %25 : vector<8x1xi32> to vector<8x8xi32>
    %29 = vector.broadcast %24 : vector<1x8xi32> to vector<8x8xi32>
    %30 = arith.cmpi ne, %28, %29 : vector<8x8xi32>
    %31 = vector.broadcast %27 : vector<1x8xi1> to vector<8x8xi1>
    %32 = arith.andi %31, %30 : vector<8x8xi1>
    %cst_14 = arith.constant 1.000000e+00 : f32
    %cst_15 = arith.constant 0.000000e+00 : f32
    %33 = vector.broadcast %cst_14 : f32 to vector<8x8xf32>
    %34 = vector.broadcast %cst_15 : f32 to vector<8x8xf32>
    %35 = arith.select %32, %33, %34 : vector<8x8xi1>, vector<8x8xf32>
    %cst_16 = arith.constant 14.2857141 : f32
    %36 = vector.broadcast %cst_16 : f32 to vector<8x128xf32>
    %37 = arith.mulf %0, %36 : vector<8x128xf32>
    %cst_17 = arith.constant dense<0.000000e+00> : vector<8x8xf32>
    %38 = tpu.matmul %37, %0, %cst_17 {dimension_numbers = #tpu.dot_dimension_numbers<[1], [1], [0], [0], [0, 0, 1, 0], [], []>} : vector<8x128xf32>, vector<8x128xf32>, vector<8x8xf32> -> vector<8x8xf32>
    %cst_18 = arith.constant -1.000000e+30 : f32
    %39 = vector.shape_cast %27 : vector<1x8xi1> to vector<1x8xi1>
    %40 = vector.broadcast %39 : vector<1x8xi1> to vector<8x8xi1>
    %41 = vector.broadcast %cst_18 : f32 to vector<8x8xf32>
    %42 = arith.select %40, %38, %41 : vector<8x8xi1>, vector<8x8xf32>
    %cst_19 = arith.constant dense<0xFF800000> : vector<8xf32>
    %43 = vector.multi_reduction <maximumf>, %42, %cst_19 [1] : vector<8x8xf32> to vector<8xf32>
    %44 = vector.shape_cast %43 : vector<8xf32> to vector<8x1xf32>
    %45 = vector.broadcast %44 : vector<8x1xf32> to vector<8x8xf32>
    %46 = arith.subf %38, %45 : vector<8x8xf32>
    %47 = arith.mulf %23, %35 : vector<8x8xf32>
    %48 = math.exp %46 : vector<8x8xf32>
    %49 = arith.mulf %48, %35 : vector<8x8xf32>
    %cst_20 = arith.constant dense<0.000000e+00> : vector<8xf32>
    %50 = vector.multi_reduction <add>, %49, %cst_20 [1] : vector<8x8xf32> to vector<8xf32>
    %51 = vector.shape_cast %50 : vector<8xf32> to vector<8x1xf32>
    %cst_21 = arith.constant 9.99999996E-13 : f32
    %52 = vector.broadcast %cst_21 : f32 to vector<8x1xf32>
    %53 = arith.addf %51, %52 : vector<8x1xf32>
    %54 = math.log %53 : vector<8x1xf32>
    %55 = vector.broadcast %54 : vector<8x1xf32> to vector<8x8xf32>
    %56 = arith.subf %46, %55 : vector<8x8xf32>
    %cst_22 = arith.constant 0.000000e+00 : f32
    %57 = vector.broadcast %cst_22 : f32 to vector<8x8xf32>
    %58 = arith.cmpf ogt, %47, %57 : vector<8x8xf32>
    %cst_23 = arith.constant 1.000000e+00 : f32
    %59 = vector.broadcast %cst_23 : f32 to vector<8x8xf32>
    %60 = arith.select %58, %59, %47 : vector<8x8xi1>, vector<8x8xf32>
    %61 = arith.mulf %47, %56 : vector<8x8xf32>
    %cst_24 = arith.constant dense<0.000000e+00> : vector<8xf32>
    %62 = vector.multi_reduction <add>, %61, %cst_24 [1] : vector<8x8xf32> to vector<8xf32>
    %63 = vector.shape_cast %62 : vector<8xf32> to vector<8x1xf32>
    %cst_25 = arith.constant dense<0.000000e+00> : vector<8xf32>
    %64 = vector.multi_reduction <add>, %60, %cst_25 [1] : vector<8x8xf32> to vector<8xf32>
    %65 = vector.shape_cast %64 : vector<8xf32> to vector<8x1xf32>
    %cst_26 = arith.constant 9.99999996E-13 : f32
    %66 = vector.broadcast %cst_26 : f32 to vector<8x1xf32>
    %67 = arith.addf %65, %66 : vector<8x1xf32>
    %68 = arith.divf %63, %67 : vector<8x1xf32>
    %cst_27 = arith.constant dense<0.000000e+00> : vector<1xf32>
    %69 = vector.multi_reduction <add>, %68, %cst_27 [0] : vector<8x1xf32> to vector<1xf32>
    %70 = vector.shape_cast %69 : vector<1xf32> to vector<1x1xf32>
    %cst_28 = arith.constant 0.000000e+00 : f32
    %71 = vector.broadcast %cst_28 : f32 to vector<1x1xf32>
    %72 = arith.subf %71, %70 : vector<1x1xf32>
    %cst_29 = arith.constant 1.250000e-01 : f32
    %73 = vector.broadcast %cst_29 : f32 to vector<1x1xf32>
    %74 = arith.mulf %72, %73 : vector<1x1xf32>
    %c0_30 = arith.constant 0 : index
    %c0_31 = arith.constant 0 : index
    %75 = vector.load %arg3[%c0_30, %c0_31] : memref<1x1xf32, #tpu.memory_space<vmem>>, vector<1x1xf32>
    tpu.vector_store %arg3[%c0_30, %c0_31], %74 {strides = array<i32>} : memref<1x1xf32, #tpu.memory_space<vmem>>, vector<1x1xf32>,
    return
  }
}

</mosaic_0001>

<bundles_post_ra>
// kernel: hmlc_loss.2
= control target key start
LH: loop header
LB: loop body
LE: loop exit
PB: predicated region body
PF: predicated region fallthrough
CT: control target
= control target key end

     0   :  { %s565_s0 = inlined_call_operand.hbm [shape: f32[14,14], index: 0, kind: input, shape index: {}]   ;;  %s566_s1 = inlined_call_operand.<no memory space> [shape: f32[], index: 1, kind: input, shape index: {}]   ;;  %s567_s2 = inlined_call_operand.hbm [shape: f32[8,14], index: 2, kind: input, shape index: {}]   ;;  %s568_s3 = inlined_call_operand.hbm [shape: f32[8,32], index: 3, kind: input, shape index: {}]   ;;  %s569_s4 = inlined_call_operand.hbm [shape: f32[1,1], index: 4, kind: output, shape index: {}]  }
   0x1   :  { %v523_v0 = vstv %s566_s1 }
   0x2   :  { %12 = vsyncpa [#allocation18], 0 }
   0x3   :  { %13 = vsyncpa [#allocation21], 0  ;;  %s31_s19 = sshll.u32 %s567_s2, 4  ;;  %s32_s19 = int_to_ptr.hbm [resolvable:$true] %s31_s19 }
   0x4   :  { %14 = vsyncpa [#allocation19], 0  ;;  %s487_s20 = smov [#allocation20]   ;;  %s20_s24 = sshll.u32 %s568_s3, 4  ;;  %s21_s24 = int_to_ptr.hbm [resolvable:$true] %s20_s24 }
   0x5   :  { %s33_s21 = sshll.u32 %s487_s20, 4  ;;  %s488_s25 = smov [#allocation17]   ;;  %s34_s21 = int_to_ptr.vmem [resolvable:$true] %s33_s21 }
   0x6   :  { %36 = dma.hbm_to_vmem [thread:$0]  %s32_s19, 128, %s34_s21, [#allocation21]  }
   0x7   :  { %s22_s1 = sshll.u32 %s488_s25, 4  ;;  %s41_s28 = sshll.u32 %s565_s0, 4  ;;  %s23_s1 = int_to_ptr.vmem [resolvable:$true] %s22_s1  ;;  %s42_s28 = int_to_ptr.hbm [resolvable:$true] %s41_s28 }
   0x8   :  { %25 = dma.hbm_to_vmem [thread:$0]  %s21_s24, 128, %s23_s1, [#allocation18]  }
   0x9   :  { %s489_s2 = smov [#allocation22]   ;;  %s490_s30 = smov 128  }
   0xa   :  { %s43_s29 = sshll.u32 %s489_s2, 4  ;;  %s491_s5 = smov 8   ;;  %s44_s29 = int_to_ptr.vmem [resolvable:$true] %s43_s29 }
   0xb   :  { %49 = dma.hbm_to_vmem [thread:$0]  %s42_s28, 256, %s44_s29, [#allocation21], %s490_s30, %s490_s30, %s491_s5  }
   0xc   :  { %481 = dma.done.wait [#allocation18], 128  }
   0xd   :  { %482 = vsyncadd [#allocation18], 4294967168 }
   0xe   :  { %483 = dma.done.wait [#allocation21], 384  }
   0xf   :  { %484 = vsyncadd [#allocation21], 4294966912  ;;  %184 = vmatpush.msra.mxu0 %v523_v0  ;;  %v63_v1 = vlaneseq  ;;  %v62_v4 = vld [vmem:[#allocation17] sm:$0xff]  ;;  %v95_v8 = vld [vmem:[#allocation22 + $0x8] sm:$0xff]  ;;  %vm300_vm5 = vcmask 64512   ;;  %v492_v20 = vmov 1.0  }
  0x10   :  { %v80_v10 = vld [vmem:[#allocation22] sm:$0xff]  ;;  %v71_v12 = vld [vmem:[#allocation20] sm:$0xff]  ;;  %v493_v24 = vmov 0.0   ;;  %s494_s0 = smov [#allocation23]   ;;  %s358_s8 = sshll.u32 %s569_s4, 4  ;;  %s359_s8 = int_to_ptr.hbm [resolvable:$true] %s358_s8 }
  0x11   :  { %185 = vmatpush.msra.mxu0 %v523_v0  ;;  %v64_v2 = vand.u32 127, %v63_v1  ;;  %v97_v3 = vshrl.u32 %v63_v1, 7  ;;  %s356_s3 = sshll.u32 %s494_s0, 4  ;;  %s357_s3 = int_to_ptr.vmem [resolvable:$true] %s356_s3 }
  0x13   :  { %186 = vmatpush.msra.mxu0 %v523_v0  ;;  %vm66_vm0 = vcmp.lt.s32.totalorder %v64_v2, 32  ;;  %vm273_vm1 = vcmp.ne.s32.totalorder %v97_v3, %v64_v2  ;;  %v98_v7 = vadd.s32 8, %v97_v3  ;;  %vm75_vm3 = vcmp.lt.s32.totalorder %v64_v2, 14 }
  0x14   :  { %v67_v5 = vsel %vm66_vm0, %v62_v4, %v523_v0  ;;  %v90_v13 = vsel %vm75_vm3, %v80_v10, %v523_v0  ;;  %v76_v14 = vsel %vm75_vm3, %v71_v12, %v523_v0  ;;  %vm272_vm4 = vcmp.lt.s32.totalorder %v64_v2, 8 }
  0x15   :  { %187 = vmatpush.msra.mxu0 %v523_v0  ;;  %294 = vmatpush.xpose.msra.mxu3 %v67_v5  ;;  %v278_v6 = vmul.f32 14.285714, %v67_v5  ;;  %vm99_vm2 = vcmp.lt.s32.totalorder %v98_v7, 14  ;;  %vm276_vm6 = vmand %vm272_vm4, %vm273_vm1  ;;  %vm349_vm1 = vcmask 0  }
  0x16   :  { %v100_v9 = vsel %vm99_vm2, %v95_v8, %v523_v0  ;;  %v277_v25 = vsel %vm276_vm6, 1.0, %v493_v24 }
  0x17   :  { %188 = vmatpush.msra.mxu0 %v523_v0  ;;  %v105_v11 = vsel %vm75_vm3, %v100_v9, %v523_v0 }
  0x18   :  { %295 = vmatmul.f32.vlgmr.msra.gmra.mxu3 %v278_v6 }
  0x19   :  { %189 = vmatpush.msra.mxu0 %v523_v0 }
  0x1b   :  { %190 = vmatpush.msra.mxu0 %v523_v0 }
  0x1d   :  { %191 = vmatpush.msra.mxu0 %v523_v0 }
  0x1f   :  { %192 = vmatpush.msra.mxu0 %v523_v0 }
  0x21   :  { %193 = vmatpush.msra.mxu0 %v523_v0 }
  0x23   :  { %194 = vmatpush.msra.mxu0 %v523_v0 }
  0x25   :  { %195 = vmatpush.msra.mxu0 %v523_v0 }
  0x27   :  { %196 = vmatpush.msra.mxu0 %v523_v0 }
  0x29   :  { %197 = vmatpush.msra.mxu0 %v523_v0 }
  0x2b   :  { %198 = vmatpush.msra.mxu0 %v105_v11 }
  0x2d   :  { %199 = vmatpush.msra.mxu0 %v90_v13 }
  0x2e   :  { %200 = vmatmul.f32.vlgmr.msra.gmra.mxu0 %v76_v14 }
  0x9b   :  { %v296_v15 = vpop.f32.mrf.mxu3 }
  0x9c   :  { %v299_v16 = vsel %vm272_vm4, %v296_v15, -1e+30 }
  0x9d   :  { %v301_v17 = vsel %vm300_vm5, %v299_v16, -inf }
  0x9e   :  { %302 = vmax.xlane.f32.xlu0 %v301_v17 }
  0xab   :  { %v201_v18 = vpop.f32.mrf.mxu0 }
  0xac   :  { %v204_v19 = vmin.f32 %v201_v18, 1.0 }
  0xae   :  { %242 = vmatpush.xpose.msra.mxu2 %v204_v19  ;;  %220 = vmatpush.xpose.msra.mxu1 %v204_v19 }
  0xaf   :  { %225 = vadd.xlane.f32.xlu0 %v204_v19 }
  0xb1   :  { %243 = vmatmul.f32.vlgmr.msra.gmra.mxu2 %v492_v20  ;;  %221 = vmatmul.f32.vlgmr.msra.gmra.mxu1 %v204_v19 }
 0x111   :  { %v303_v21 = vpop.xlane.xlu0 %302 }
 0x112   :  { %v304_v22 = vsub.f32 %v296_v15, %v303_v21 }
 0x114   :  { %v306_v23 = vmul.f32 1.442695, %v304_v22 }
 0x116   :  { %377 = vpow2.f32 %v306_v23 }
 0x11c   :  { %v378_v26 = vpop.eup %377 }
 0x11d   :  { %v308_v27 = vmul.f32 %v378_v26, %v277_v25 }
 0x11f   :  { %v309_v28 = vsel %vm300_vm5, %v308_v27, 0.0 }
 0x120   :  { %310 = vadd.xlane.f32.xlu1 %v309_v28 }
 0x122   :  { %v226_v30 = vpop.xlane.xlu0 %225 }
 0x12e   :  { %v222_v32 = vpop.f32.mrf.mxu1 }
 0x134   :  { %v244_v29 = vpop.f32.mrf.mxu2 }
 0x135   :  { %v247_v31 = vperm.slane %v244_v29, 0 }
 0x137   :  { %v248_v33 = vadd.f32 %v247_v31, %v226_v30 }
 0x139   :  { %v249_v34 = vsub.f32 %v248_v33, %v222_v32 }
 0x13b   :  { %vm250_vm7 = vcmp.gt.f32.partialorder %v249_v34, 0.0 }
 0x13c   :  { %v251_v35 = vsel %vm250_vm7, %v249_v34, 1.0 }
 0x13d   :  { %379 = vrcp.f32 %v251_v35  ;;  %v263_v38 = vand.u32 2147483648, %v251_v35  ;;  %vm257_vm8 = vweird.f32 %v251_v35  ;;  %v261_v40 = vand.u32 2147483647, %v251_v35 }
 0x13f   :  { %v264_v42 = vor.u32 1.1754944e-38, %v263_v38  ;;  %vm262_vm11 = vcmp.eq.f32.partialorder %v261_v40, 8.507059e+37 }
 0x143   :  { %v380_v36 = vpop.eup %379 }
 0x144   :  { %v253_v37 = vmul.f32 %v380_v36, %v251_v35  ;;  %vm258_vm9 = vweird.f32 %v380_v36 }
 0x145   :  { %vm259_vm10 = vmor %vm257_vm8, %vm258_vm9 }
 0x146   :  { %v254_v39 = vsub.f32 1.0, %v253_v37 }
 0x148   :  { %v255_v41 = vmul.f32 %v380_v36, %v254_v39 }
 0x14a   :  { %v256_v43 = vadd.f32 %v380_v36, %v255_v41 }
 0x14c   :  { %v260_v44 = vsel %vm259_vm10, %v380_v36, %v256_v43 }
 0x14d   :  { %v265_v45 = vsel %vm262_vm11, %v264_v42, %v260_v44 }
 0x14e   :  { %v266_v46 = vmul.f32 %v265_v45, %v222_v32 }
 0x150   :  { %v267_v47 = vsel %vm250_vm7, %v266_v46, 0.0 }
 0x151   :  { %v305_v48 = vmul.f32 %v277_v25, %v267_v47 }
 0x153   :  { %vm316_vm12 = vcmp.gt.f32.partialorder %v305_v48, 0.0 }
 0x154   :  { %v317_v49 = vsel %vm316_vm12, 1.0, %v305_v48 }
 0x155   :  { %v322_v50 = vsel %vm300_vm5, %v317_v49, 0.0 }
 0x156   :  { %323 = vadd.xlane.f32.xlu1 %v322_v50 }
 0x193   :  { %v311_v51 = vpop.xlane.xlu1 %310 }
 0x194   :  { %v312_v52 = vadd.f32 1e-12, %v311_v51 }
 0x196   :  { %381 = vlog2.f32 %v312_v52 }
 0x19c   :  { %v382_v53 = vpop.eup %381 }
 0x19d   :  { %v314_v54 = vmul.f32 0.6931472, %v382_v53 }
 0x19f   :  { %v315_v55 = vsub.f32 %v304_v22, %v314_v54 }
 0x1a1   :  { %v318_v56 = vmul.f32 %v315_v55, %v305_v48 }
 0x1a3   :  { %v319_v57 = vsel %vm300_vm5, %v318_v56, 0.0 }
 0x1a4   :  { %320 = vadd.xlane.f32.xlu2 %v319_v57 }
 0x1c9   :  { %v324_v58 = vpop.xlane.xlu1 %323 }
 0x1ca   :  { %v325_v59 = vadd.f32 1e-12, %v324_v58 }
 0x1cc   :  { %383 = vrcp.f32 %v325_v59  ;;  %vm331_vm13 = vweird.f32 %v325_v59  ;;  %v337_v0 = vand.u32 2147483648, %v325_v59  ;;  %v335_v2 = vand.u32 2147483647, %v325_v59 }
 0x1ce   :  { %v338_v3 = vor.u32 1.1754944e-38, %v337_v0  ;;  %vm336_vm0 = vcmp.eq.f32.partialorder %v335_v2, 8.507059e+37 }
 0x1d2   :  { %v384_v60 = vpop.eup %383 }
 0x1d3   :  { %v327_v61 = vmul.f32 %v384_v60, %v325_v59  ;;  %vm332_vm14 = vweird.f32 %v384_v60 }
 0x1d4   :  { %vm333_vm15 = vmor %vm331_vm13, %vm332_vm14 }
 0x1d5   :  { %v328_v62 = vsub.f32 1.0, %v327_v61 }
 0x1d7   :  { %v329_v63 = vmul.f32 %v384_v60, %v328_v62 }
 0x1d9   :  { %v330_v1 = vadd.f32 %v384_v60, %v329_v63 }
 0x1db   :  { %v334_v4 = vsel %vm333_vm15, %v384_v60, %v330_v1 }
 0x1dc   :  { %v339_v6 = vsel %vm336_vm0, %v338_v3, %v334_v4 }
 0x217   :  { %v321_v5 = vpop.xlane.xlu2 %320 }
 0x218   :  { %v340_v7 = vmul.f32 %v339_v6, %v321_v5 }
 0x21a   :  { %v341_v8 = vrot.slane %v340_v7, 4 }
 0x21c   :  { %v342_v9 = vadd.f32 %v341_v8, %v340_v7 }
 0x21e   :  { %v343_v10 = vrot.slane %v342_v9, 2 }
 0x220   :  { %v344_v11 = vadd.f32 %v343_v10, %v342_v9 }
 0x222   :  { %v345_v12 = vrot.slane %v344_v11, 1 }
 0x224   :  { %v346_v13 = vadd.f32 %v345_v12, %v344_v11 }
 0x226   :  { %v347_v14 = vsub.f32 0.0, %v346_v13 }
 0x228   :  { %v348_v15 = vmul.f32 0.125, %v347_v14 }
 0x22a   :  { %350 = vst.msk [vmem:[#allocation23] sm:$0x1] %vm349_vm1, %v348_v15 }
 0x22b   :  { %361 = dma.vmem_to_hbm [thread:$0]  %s357_s3, 16, %s359_s8, [#allocation19]  }
 0x22c   :  { %485 = dma.done.wait [#allocation19], 16  }
 0x22d   :  { %486 = vsyncadd [#allocation19], 4294967280 }
 0x22e   :  { %366 = vsyncpa [#allocation18], 1 }
 0x22f   :  { %367 = vsyncpa [#allocation21], 1 }
 0x230   :  { %368 = vsyncpa [#allocation19], 1 }

</bundles_post_ra>
